<compile_context>
chip_gen: v7x
topology: tpu7x:2x2x1
jax: 0.10.0
libtpu: 0.0.40
codegen_flags: <defaults>
</compile_context>

<pallas_src>
import math

import jax
import jax.numpy as jnp
from jax.experimental import pallas as pl
from jax.experimental.pallas import tpu as pltpu

# ---------------- configuration (consistent with the module) -----------------
CONT_DIM = 4          # config.data.continuos_dimensions
DISC_DIM = 5          # config.data.discrete_dimensions
VOCAB = 6             # config.data.vocab_size
VOCAB_PAD = 8         # vocab padded to a sublane multiple for the one-hot dot
DISC_EMBED = 8        # config.mixed_network.discrete_embed_dim
TIME_EMBED = 16       # config.mixed_network.time_embed_dim
HIDDEN = 32           # config.mixed_network.hidden_dim
NUM_LAYERS = 3        # config.mixed_network.num_layers
BN_EPS = 1e-5
MAX_POSITIONS = 10000.0
IN_DIM = CONT_DIM + DISC_EMBED * DISC_DIM + TIME_EMBED          # 60
HEAD_DIM = DISC_DIM * VOCAB + CONT_DIM                          # 34 (fused heads)
DV = DISC_DIM * VOCAB_PAD                                       # 40
MAX_BATCH_TILE = 2048  # per-step VMEM ~3 MiB @ 2048 rows -> fits v5e/v6e/v7x


# ---------------- Pallas kernel ----------------------------------------------
def mixed_mlp_kernel(xc_ref, xd_ref, t_ref,
                     w0c_ref, g_ref, m_disc_ref, w0t_ref, b0_ref,
                     w_hid_ref, b_hid_ref, w_head_ref, b_head_ref,
                     out_ref):
    f32 = jnp.float32
    bt = xc_ref.shape[0]

    # ---- layer 0 (Linear+BN folded) over [x_cont | embed(x_disc) | time_emb] ----
    # continuous row-slice of W0
    acc = jnp.dot(xc_ref[...], w0c_ref[...], preferred_element_type=f32)

    # discrete row-slice: nn.Embedding folded into a (40, 32) table
    # (emb_pad @ W0-slice per dim, stacked dim-major).  Lookup expressed as a
    # single one-hot matmul.  The one-hot over 40 lanes is built by (a) a tiny
    # "replicate column d into its 8 lanes" matmul and (b) one VPU compare —
    # all values involved are small exact integers.
    xd_f = xd_ref[...].astype(f32)                                # (bt, 5)
    dim_off = (jax.lax.broadcasted_iota(jnp.int32, (1, DISC_DIM), 1)
               .astype(f32) * VOCAB_PAD)                          # (1, 5)
    xd_shift = xd_f + dim_off                                     # (bt, 5): v + 8*d
    rep = jnp.dot(xd_shift, g_ref[...], preferred_element_type=f32)   # (bt, 40)
    iota_dv = jax.lax.broadcasted_iota(jnp.int32, (bt, DV), 1).astype(f32)
    onehot = jnp.where(rep == iota_dv, 1.0, 0.0)                  # (bt, 40)
    acc += jnp.dot(onehot, m_disc_ref[...], preferred_element_type=f32)

    # time row-slice: sinusoidal transformer_timestep_embedding computed in-kernel
    half = TIME_EMBED // 2
    freqs = jnp.exp(
        jax.lax.broadcasted_iota(jnp.int32, (1, half), 1).astype(f32)
        * (-math.log(MAX_POSITIONS) / (half - 1)))                # (1, half)
    args = t_ref[...] * freqs                                     # (bt, half)
    acc += jnp.dot(jnp.sin(args), w0t_ref[0], preferred_element_type=f32)
    acc += jnp.dot(jnp.cos(args), w0t_ref[1], preferred_element_type=f32)

    h = jnp.maximum(acc + b0_ref[...], 0.0)

    # ---- hidden layers 1..NUM_LAYERS-1 (BN pre-folded); bf16 MXU, f32 accum ----
    for l in range(NUM_LAYERS - 1):
        acc = jnp.dot(h.astype(jnp.bfloat16), w_hid_ref[l],
                      preferred_element_type=f32)
        h = jnp.maximum(acc + b_hid_ref[l], 0.0)

    # ---- fused heads: one matmul, one output store ----
    out_ref[...] = (jnp.dot(h.astype(jnp.bfloat16), w_head_ref[...],
                            preferred_element_type=f32) + b_head_ref[...])


# ---------------- host-side parameter folding ---------------------------------
def fold_params(params):
    """Fold eval-mode BN into the Linears, fold the embedding into layer 0,
    fuse the two heads, and pack hidden layers into stacked buffers."""
    def bn_fold(w, b, gamma, beta, mean, var):
        scale = gamma * jax.lax.rsqrt(var + BN_EPS)               # (1, H)
        return w * scale, (b - mean) * scale + beta

    # layer 0, split by input slices: [cont | disc_embed | time_embed]
    l0 = params["layers"][0]
    w0, b0 = bn_fold(l0["w"], l0["b"], l0["gamma"], l0["beta"], l0["mean"], l0["var"])
    w0c = w0[:CONT_DIM].astype(jnp.float32)                                   # (4, 32)
    w0d = w0[CONT_DIM:CONT_DIM + DISC_DIM * DISC_EMBED]                       # (40, 32)
    w0t_full = w0[CONT_DIM + DISC_DIM * DISC_EMBED:]                          # (16, 32)
    half = TIME_EMBED // 2
    w0t = jnp.stack([w0t_full[:half], w0t_full[half:]], axis=0).astype(jnp.float32)  # (2, 8, 32)

    # embedding folded into per-dim (vocab_pad x hidden) tables, stacked dim-major
    emb_pad = jnp.zeros((VOCAB_PAD, DISC_EMBED), jnp.float32)
    emb_pad = emb_pad.at[:VOCAB].set(params["embedding"])
    m_disc = jnp.concatenate(
        [emb_pad @ w0d[d * DISC_EMBED:(d + 1) * DISC_EMBED] for d in range(DISC_DIM)],
        axis=0).astype(jnp.float32)                                           # (40, 32)

    # column-replication matrix: g[d, j] = 1 iff j // VOCAB_PAD == d
    g = (jnp.arange(DISC_DIM)[:, None]
         == (jnp.arange(DV)[None, :] // VOCAB_PAD)).astype(jnp.float32)       # (5, 40)

    # layers 1..NUM_LAYERS-1 packed
    w_hids, b_hids = [], []
    for l in range(1, NUM_LAYERS):
        ll = params["layers"][l]
        w, b = bn_fold(ll["w"], ll["b"], ll["gamma"], ll["beta"], ll["mean"], ll["var"])
        w_hids.append(w.astype(jnp.bfloat16))
        b_hids.append(b.astype(jnp.float32))
    w_hid = jnp.stack(w_hids, axis=0)                                         # (L-1, 32, 32) bf16
    b_hid = jnp.stack(b_hids, axis=0)                                         # (L-1, 1, 32) f32

    # fused heads
    w_head = jnp.concatenate([params["w_dh"], params["w_ch"]], axis=1).astype(jnp.bfloat16)  # (32, 34)
    b_head = jnp.concatenate([params["b_dh"], params["b_ch"]], axis=1).astype(jnp.float32)   # (1, 34)

    return dict(w0c=w0c, g=g, m_disc=m_disc, w0t=w0t, b0=b0.astype(jnp.float32),
                w_hid=w_hid, b_hid=b_hid, w_head=w_head, b_head=b_head)


# ---------------- pallas_call wrapper -----------------------------------------
def _round_up(x, m):
    return ((x + m - 1) // m) * m


def _choose_tile(batch):
    """Balanced batch tile (multiple of 8, <= MAX_BATCH_TILE) minimizing padding."""
    n_tiles = -(-batch // MAX_BATCH_TILE)
    return _round_up(-(-batch // n_tiles), 8)


def _tiled_spec(shape, bt):
    nd = len(shape)

    def imap(i):
        return (i,) + (0,) * (nd - 1)

    return pl.BlockSpec((bt,) + tuple(shape[1:]), imap)


def _resident_spec(shape):
    nd = len(shape)

    def imap(i):
        return (0,) * nd

    return pl.BlockSpec(tuple(shape), imap)


def run_mixed_mlp(kp, x_cont, x_disc, times_col):
    batch = x_cont.shape[0]
    bt = _choose_tile(batch)
    padded = _round_up(batch, bt)
    if padded != batch:
        pad = padded - batch
        x_cont = jnp.pad(x_cont, ((0, pad), (0, 0)))
        x_disc = jnp.pad(x_disc, ((0, pad), (0, 0)))
        times_col = jnp.pad(times_col, ((0, pad), (0, 0)))

    weights = (kp["w0c"], kp["g"], kp["m_disc"], kp["w0t"], kp["b0"],
               kp["w_hid"], kp["b_hid"], kp["w_head"], kp["b_head"])

    in_specs = ([_tiled_spec(x_cont.shape, bt),
                 _tiled_spec(x_disc.shape, bt),
                 _tiled_spec(times_col.shape, bt)]
                + [_resident_spec(w.shape) for w in weights])

    flops = 2 * padded * (CONT_DIM * HIDDEN
                          + DISC_DIM * DV
                          + DV * HIDDEN
                          + TIME_EMBED * HIDDEN
                          + (NUM_LAYERS - 1) * HIDDEN * HIDDEN
                          + HIDDEN * HEAD_DIM)
    param_bytes = sum(math.prod(w.shape) * w.dtype.itemsize for w in weights)
    bytes_accessed = int(
        padded * 4 * (x_cont.shape[1] + x_disc.shape[1] + times_col.shape[1] + HEAD_DIM)
        + param_bytes)

    out = pl.pallas_call(
        mixed_mlp_kernel,
        out_shape=jax.ShapeDtypeStruct((padded, HEAD_DIM), jnp.float32),
        grid=(padded // bt,),
        in_specs=in_specs,
        out_specs=pl.BlockSpec((bt, HEAD_DIM), lambda i: (i, 0)),
        compiler_params=pltpu.CompilerParams(
            dimension_semantics=("parallel",),
            vmem_limit_bytes=32 * 1024 * 1024),
        cost_estimate=pl.CostEstimate(
            flops=int(flops),
            transcendentals=int(padded * TIME_EMBED),
            bytes_accessed=bytes_accessed),
    )(x_cont, x_disc, times_col, *weights)
    return out[:batch]


@jax.jit
def mixed_deep_mlp_forward(params, x_discrete, x_continuous, times):
    x_disc = x_discrete.astype(jnp.int32)
    x_cont = x_continuous.astype(jnp.float32)
    t = times.reshape(-1).astype(jnp.float32)[:, None]            # (B, 1)
    batch = x_cont.shape[0]

    kp = fold_params(params)
    out = run_mixed_mlp(kp, x_cont, x_disc, t)                    # (B, 34)
    discrete_head = out[:, :DISC_DIM * VOCAB].reshape(batch, DISC_DIM, VOCAB)
    continuous_head = out[:, DISC_DIM * VOCAB:]
    return discrete_head, continuous_head


# ---------------- pure-JAX reference of the PyTorch forward -------------------
def transformer_timestep_embedding(times, embedding_dim, max_positions=10000):
    half_dim = embedding_dim // 2
    emb = math.log(max_positions) / (half_dim - 1)
    freqs = jnp.exp(jnp.arange(half_dim, dtype=jnp.float32) * -emb)
    args = times.astype(jnp.float32)[:, None] * freqs[None, :]
    return jnp.concatenate([jnp.sin(args), jnp.cos(args)], axis=1)


def reference_forward(params, x_discrete, x_continuous, times):
    x_discrete = x_discrete.astype(jnp.int32)
    t = times.reshape(-1)
    batch = x_continuous.shape[0]
    emb = jnp.take(params["embedding"], x_discrete, axis=0).reshape(batch, -1)
    te = transformer_timestep_embedding(t, TIME_EMBED)
    h = jnp.concatenate([x_continuous.astype(jnp.float32), emb, te], axis=1)
    for layer in params["layers"]:
        h = h @ layer["w"] + layer["b"]
        h = (h - layer["mean"]) * jax.lax.rsqrt(layer["var"] + BN_EPS) * layer["gamma"] + layer["beta"]
        h = jnp.maximum(h, 0.0)
    disc = (h @ params["w_dh"] + params["b_dh"]).reshape(batch, DISC_DIM, VOCAB)
    cont = h @ params["w_ch"] + params["b_ch"]
    return disc, cont


# ---------------- deterministic parameter initialization ----------------------
def init_params(key):
    def xavier_uniform(k, fan_in, fan_out):
        bound = math.sqrt(6.0 / (fan_in + fan_out))
        return jax.random.uniform(k, (fan_in, fan_out), jnp.float32, -bound, bound)

    def bias_init(k, fan_in, fan_out):
        bound = 1.0 / math.sqrt(fan_in)
        return jax.random.uniform(k, (1, fan_out), jnp.float32, -bound, bound)

    keys = iter(jax.random.split(key, 64))
    params = {"embedding": jax.random.normal(next(keys), (VOCAB, DISC_EMBED), jnp.float32)}

    layers = []
    fan_in = IN_DIM
    for _ in range(NUM_LAYERS):
        layers.append({
            "w": xavier_uniform(next(keys), fan_in, HIDDEN),
            "b": bias_init(next(keys), fan_in, HIDDEN),
            # non-trivial eval-mode BN stats so the host-side folding is exercised
            "gamma": jax.random.uniform(next(keys), (1, HIDDEN), jnp.float32, 0.5, 1.5),
            "beta": 0.1 * jax.random.normal(next(keys), (1, HIDDEN), jnp.float32),
            "mean": 0.2 * jax.random.normal(next(keys), (1, HIDDEN), jnp.float32),
            "var": jax.random.uniform(next(keys), (1, HIDDEN), jnp.float32, 0.5, 1.5),
        })
        fan_in = HIDDEN
    params["layers"] = layers

    bound_w = 1.0 / math.sqrt(HIDDEN)
    params["w_dh"] = jax.random.uniform(next(keys), (HIDDEN, DISC_DIM * VOCAB),
                                        jnp.float32, -bound_w, bound_w)
    params["b_dh"] = bias_init(next(keys), HIDDEN, DISC_DIM * VOCAB)
    params["w_ch"] = jax.random.uniform(next(keys), (HIDDEN, CONT_DIM),
                                        jnp.float32, -bound_w, bound_w)
    params["b_ch"] = bias_init(next(keys), HIDDEN, CONT_DIM)
    return params


if __name__ == "__main__":
    # ---- small deterministic test (B = 8) ----
    B = 8
    root = jax.random.PRNGKey(0)
    k_params, k_disc, k_cont, k_time = jax.random.split(root, 4)

    params = init_params(k_params)
    x_discrete = jax.random.randint(k_disc, (B, DISC_DIM), 0, VOCAB)
    x_continuous = jax.random.normal(k_cont, (B, CONT_DIM), jnp.float32)
    times = jax.random.uniform(k_time, (B, 1), jnp.float32)       # 2-D, gets flattened

    disc, cont = mixed_deep_mlp_forward(params, x_discrete, x_continuous, times)
    jax.block_until_ready((disc, cont))
    assert disc.shape == (B, DISC_DIM, VOCAB)
    assert cont.shape == (B, CONT_DIM)

    ref_disc, ref_cont = reference_forward(params, x_discrete, x_continuous, times)
    assert bool(jnp.allclose(disc, ref_disc, rtol=5e-2, atol=5e-2))
    assert bool(jnp.allclose(cont, ref_cont, rtol=5e-2, atol=5e-2))

    # ---- larger batch exercising the batch grid (multiple balanced tiles + padding) ----
    B2 = 2500
    k2d, k2c, k2t = jax.random.split(jax.random.PRNGKey(1), 3)
    xd2 = jax.random.randint(k2d, (B2, DISC_DIM), 0, VOCAB)
    xc2 = jax.random.normal(k2c, (B2, CONT_DIM), jnp.float32)
    t2 = jax.random.uniform(k2t, (B2,), jnp.float32)
    d2, c2 = mixed_deep_mlp_forward(params, xd2, xc2, t2)
    jax.block_until_ready((d2, c2))
    assert d2.shape == (B2, DISC_DIM, VOCAB) and c2.shape == (B2, CONT_DIM)
    rd2, rc2 = reference_forward(params, xd2, xc2, t2)
    assert bool(jnp.allclose(d2, rd2, rtol=5e-2, atol=5e-2))
    assert bool(jnp.allclose(c2, rc2, rtol=5e-2, atol=5e-2))

    print("KERNEL_OK")
</pallas_src>

<mosaic_0001>
module attributes {stable_mosaic.version = 11 : i64} {
  func.func @mixed_mlp_kernel(%arg0: i32, %arg1: memref<8x4xf32, #tpu.memory_space<vmem>>, %arg2: memref<8x5xi32, #tpu.memory_space<vmem>>, %arg3: memref<8x1xf32, #tpu.memory_space<vmem>>, %arg4: memref<4x32xf32, #tpu.memory_space<vmem>>, %arg5: memref<5x40xf32, #tpu.memory_space<vmem>>, %arg6: memref<40x32xf32, #tpu.memory_space<vmem>>, %arg7: memref<2x8x32xf32, #tpu.memory_space<vmem>>, %arg8: memref<1x32xf32, #tpu.memory_space<vmem>>, %arg9: memref<2x32x32xbf16, #tpu.memory_space<vmem>>, %arg10: memref<2x1x32xf32, #tpu.memory_space<vmem>>, %arg11: memref<32x34xbf16, #tpu.memory_space<vmem>>, %arg12: memref<1x34xf32, #tpu.memory_space<vmem>>, %arg13: memref<8x34xf32, #tpu.memory_space<vmem>>) attributes {dimension_semantics = [#tpu.dimension_semantics<parallel>], iteration_bounds = array<i64: 1>, scalar_prefetch = 0 : i64, scratch_operands = 0 : i64, tpu.core_type = #tpu.core_type<tc>, window_params = [{transform_indices = @transform_0, window_bounds = array<i64: 8, 4>}, {transform_indices = @transform_1, window_bounds = array<i64: 8, 5>}, {transform_indices = @transform_2, window_bounds = array<i64: 8, 1>}, {pipeline_mode = #tpu.pipeline_mode<synchronous>, transform_indices = @transform_3, window_bounds = array<i64: 4, 32>}, {pipeline_mode = #tpu.pipeline_mode<synchronous>, transform_indices = @transform_4, window_bounds = array<i64: 5, 40>}, {pipeline_mode = #tpu.pipeline_mode<synchronous>, transform_indices = @transform_5, window_bounds = array<i64: 40, 32>}, {pipeline_mode = #tpu.pipeline_mode<synchronous>, transform_indices = @transform_6, window_bounds = array<i64: 2, 8, 32>}, {pipeline_mode = #tpu.pipeline_mode<synchronous>, transform_indices = @transform_7, window_bounds = array<i64: 1, 32>}, {pipeline_mode = #tpu.pipeline_mode<synchronous>, transform_indices = @transform_8, window_bounds = array<i64: 2, 32, 32>}, {pipeline_mode = #tpu.pipeline_mode<synchronous>, transform_indices = @transform_9, window_bounds = array<i64: 2, 1, 32>}, {pipeline_mode = #tpu.pipeline_mode<synchronous>, transform_indices = @transform_10, window_bounds = array<i64: 32, 34>}, {pipeline_mode = #tpu.pipeline_mode<synchronous>, transform_indices = @transform_11, window_bounds = array<i64: 1, 34>}, {transform_indices = @transform_12, window_bounds = array<i64: 8, 34>}]} {
    %c0 = arith.constant 0 : index
    %c0_0 = arith.constant 0 : index
    %0 = vector.load %arg1[%c0, %c0_0] : memref<8x4xf32, #tpu.memory_space<vmem>>, vector<8x4xf32>
    %c0_1 = arith.constant 0 : index
    %c0_2 = arith.constant 0 : index
    %1 = vector.load %arg4[%c0_1, %c0_2] : memref<4x32xf32, #tpu.memory_space<vmem>>, vector<4x32xf32>
    %cst = arith.constant dense<0.000000e+00> : vector<8x32xf32>
    %2 = tpu.matmul %0, %1, %cst {dimension_numbers = #tpu.dot_dimension_numbers<[1], [0], [0], [1], [0, 0, 1, 1], [], []>} : vector<8x4xf32>, vector<4x32xf32>, vector<8x32xf32> -> vector<8x32xf32>
    %c0_3 = arith.constant 0 : index
    %c0_4 = arith.constant 0 : index
    %3 = vector.load %arg2[%c0_3, %c0_4] : memref<8x5xi32, #tpu.memory_space<vmem>>, vector<8x5xi32>
    %4 = arith.sitofp %3 : vector<8x5xi32> to vector<8x5xf32>
    %5 = tpu.iota {dimensions = array<i32: 1>} : vector<1x5xi32>
    %6 = arith.sitofp %5 : vector<1x5xi32> to vector<1x5xf32>
    %cst_5 = arith.constant 8.000000e+00 : f32
    %7 = vector.broadcast %cst_5 : f32 to vector<1x5xf32>
    %8 = arith.mulf %6, %7 : vector<1x5xf32>
    %9 = vector.broadcast %8 : vector<1x5xf32> to vector<8x5xf32>
    %10 = arith.addf %4, %9 : vector<8x5xf32>
    %c0_6 = arith.constant 0 : index
    %c0_7 = arith.constant 0 : index
    %11 = vector.load %arg5[%c0_6, %c0_7] : memref<5x40xf32, #tpu.memory_space<vmem>>, vector<5x40xf32>
    %cst_8 = arith.constant dense<0.000000e+00> : vector<8x40xf32>
    %12 = tpu.matmul %10, %11, %cst_8 {dimension_numbers = #tpu.dot_dimension_numbers<[1], [0], [0], [1], [0, 0, 1, 1], [], []>} : vector<8x5xf32>, vector<5x40xf32>, vector<8x40xf32> -> vector<8x40xf32>
    %13 = tpu.iota {dimensions = array<i32: 1>} : vector<8x40xi32>
    %14 = arith.sitofp %13 : vector<8x40xi32> to vector<8x40xf32>
    %15 = arith.cmpf oeq, %12, %14 : vector<8x40xf32>
    %cst_9 = arith.constant 1.000000e+00 : f32
    %cst_10 = arith.constant 0.000000e+00 : f32
    %16 = vector.broadcast %cst_9 : f32 to vector<8x40xf32>
    %17 = vector.broadcast %cst_10 : f32 to vector<8x40xf32>
    %18 = arith.select %15, %16, %17 : vector<8x40xi1>, vector<8x40xf32>
    %c0_11 = arith.constant 0 : index
    %c0_12 = arith.constant 0 : index
    %19 = vector.load %arg6[%c0_11, %c0_12] : memref<40x32xf32, #tpu.memory_space<vmem>>, vector<40x32xf32>
    %cst_13 = arith.constant dense<0.000000e+00> : vector<8x32xf32>
    %20 = tpu.matmul %18, %19, %cst_13 {dimension_numbers = #tpu.dot_dimension_numbers<[1], [0], [0], [1], [0, 0, 1, 1], [], []>} : vector<8x40xf32>, vector<40x32xf32>, vector<8x32xf32> -> vector<8x32xf32>
    %21 = arith.addf %2, %20 : vector<8x32xf32>
    %22 = tpu.iota {dimensions = array<i32: 1>} : vector<1x8xi32>
    %23 = arith.sitofp %22 : vector<1x8xi32> to vector<1x8xf32>
    %cst_14 = arith.constant -1.31576288 : f32
    %24 = vector.broadcast %cst_14 : f32 to vector<1x8xf32>
    %25 = arith.mulf %23, %24 : vector<1x8xf32>
    %26 = math.exp %25 : vector<1x8xf32>
    %c0_15 = arith.constant 0 : index
    %c0_16 = arith.constant 0 : index
    %27 = vector.load %arg3[%c0_15, %c0_16] : memref<8x1xf32, #tpu.memory_space<vmem>>, vector<8x1xf32>
    %28 = vector.broadcast %27 : vector<8x1xf32> to vector<8x8xf32>
    %29 = vector.broadcast %26 : vector<1x8xf32> to vector<8x8xf32>
    %30 = arith.mulf %28, %29 : vector<8x8xf32>
    %31 = math.sin %30 : vector<8x8xf32>
    %c0_17 = arith.constant 0 : index
    %c0_18 = arith.constant 0 : index
    %c0_19 = arith.constant 0 : index
    %32 = vector.load %arg7[%c0_17, %c0_18, %c0_19] : memref<2x8x32xf32, #tpu.memory_space<vmem>>, vector<1x8x32xf32>
    %33 = vector.shape_cast %32 : vector<1x8x32xf32> to vector<8x32xf32>
    %cst_20 = arith.constant dense<0.000000e+00> : vector<8x32xf32>
    %34 = tpu.matmul %31, %33, %cst_20 {dimension_numbers = #tpu.dot_dimension_numbers<[1], [0], [0], [1], [0, 0, 1, 1], [], []>} : vector<8x8xf32>, vector<8x32xf32>, vector<8x32xf32> -> vector<8x32xf32>
    %35 = arith.addf %21, %34 : vector<8x32xf32>
    %36 = math.cos %30 : vector<8x8xf32>
    %c1 = arith.constant 1 : index
    %c0_21 = arith.constant 0 : index
    %c0_22 = arith.constant 0 : index
    %37 = vector.load %arg7[%c1, %c0_21, %c0_22] : memref<2x8x32xf32, #tpu.memory_space<vmem>>, vector<1x8x32xf32>
    %38 = vector.shape_cast %37 : vector<1x8x32xf32> to vector<8x32xf32>
    %cst_23 = arith.constant dense<0.000000e+00> : vector<8x32xf32>
    %39 = tpu.matmul %36, %38, %cst_23 {dimension_numbers = #tpu.dot_dimension_numbers<[1], [0], [0], [1], [0, 0, 1, 1], [], []>} : vector<8x8xf32>, vector<8x32xf32>, vector<8x32xf32> -> vector<8x32xf32>
    %40 = arith.addf %35, %39 : vector<8x32xf32>
    %c0_24 = arith.constant 0 : index
    %c0_25 = arith.constant 0 : index
    %41 = vector.load %arg8[%c0_24, %c0_25] : memref<1x32xf32, #tpu.memory_space<vmem>>, vector<1x32xf32>
    %42 = vector.broadcast %41 : vector<1x32xf32> to vector<8x32xf32>
    %43 = arith.addf %40, %42 : vector<8x32xf32>
    %cst_26 = arith.constant 0.000000e+00 : f32
    %44 = vector.broadcast %cst_26 : f32 to vector<8x32xf32>
    %45 = arith.maximumf %43, %44 : vector<8x32xf32>
    %46 = arith.truncf %45 : vector<8x32xf32> to vector<8x32xbf16>
    %c0_27 = arith.constant 0 : index
    %c0_28 = arith.constant 0 : index
    %c0_29 = arith.constant 0 : index
    %47 = vector.load %arg9[%c0_27, %c0_28, %c0_29] : memref<2x32x32xbf16, #tpu.memory_space<vmem>>, vector<1x32x32xbf16>
    %48 = vector.shape_cast %47 : vector<1x32x32xbf16> to vector<32x32xbf16>
    %cst_30 = arith.constant dense<0.000000e+00> : vector<8x32xf32>
    %49 = tpu.matmul %46, %48, %cst_30 {dimension_numbers = #tpu.dot_dimension_numbers<[1], [0], [0], [1], [0, 0, 1, 1], [], []>} : vector<8x32xbf16>, vector<32x32xbf16>, vector<8x32xf32> -> vector<8x32xf32>
    %c0_31 = arith.constant 0 : index
    %c0_32 = arith.constant 0 : index
    %c0_33 = arith.constant 0 : index
    %50 = vector.load %arg10[%c0_31, %c0_32, %c0_33] : memref<2x1x32xf32, #tpu.memory_space<vmem>>, vector<1x1x32xf32>
    %51 = vector.shape_cast %50 : vector<1x1x32xf32> to vector<1x32xf32>
    %52 = vector.broadcast %51 : vector<1x32xf32> to vector<8x32xf32>
    %53 = arith.addf %49, %52 : vector<8x32xf32>
    %cst_34 = arith.constant 0.000000e+00 : f32
    %54 = vector.broadcast %cst_34 : f32 to vector<8x32xf32>
    %55 = arith.maximumf %53, %54 : vector<8x32xf32>
    %56 = arith.truncf %55 : vector<8x32xf32> to vector<8x32xbf16>
    %c1_35 = arith.constant 1 : index
    %c0_36 = arith.constant 0 : index
    %c0_37 = arith.constant 0 : index
    %57 = vector.load %arg9[%c1_35, %c0_36, %c0_37] : memref<2x32x32xbf16, #tpu.memory_space<vmem>>, vector<1x32x32xbf16>
    %58 = vector.shape_cast %57 : vector<1x32x32xbf16> to vector<32x32xbf16>
    %cst_38 = arith.constant dense<0.000000e+00> : vector<8x32xf32>
    %59 = tpu.matmul %56, %58, %cst_38 {dimension_numbers = #tpu.dot_dimension_numbers<[1], [0], [0], [1], [0, 0, 1, 1], [], []>} : vector<8x32xbf16>, vector<32x32xbf16>, vector<8x32xf32> -> vector<8x32xf32>
    %c1_39 = arith.constant 1 : index
    %c0_40 = arith.constant 0 : index
    %c0_41 = arith.constant 0 : index
    %60 = vector.load %arg10[%c1_39, %c0_40, %c0_41] : memref<2x1x32xf32, #tpu.memory_space<vmem>>, vector<1x1x32xf32>
    %61 = vector.shape_cast %60 : vector<1x1x32xf32> to vector<1x32xf32>
    %62 = vector.broadcast %61 : vector<1x32xf32> to vector<8x32xf32>
    %63 = arith.addf %59, %62 : vector<8x32xf32>
    %cst_42 = arith.constant 0.000000e+00 : f32
    %64 = vector.broadcast %cst_42 : f32 to vector<8x32xf32>
    %65 = arith.maximumf %63, %64 : vector<8x32xf32>
    %66 = arith.truncf %65 : vector<8x32xf32> to vector<8x32xbf16>
    %c0_43 = arith.constant 0 : index
    %c0_44 = arith.constant 0 : index
    %67 = vector.load %arg11[%c0_43, %c0_44] : memref<32x34xbf16, #tpu.memory_space<vmem>>, vector<32x34xbf16>
    %cst_45 = arith.constant dense<0.000000e+00> : vector<8x34xf32>
    %68 = tpu.matmul %66, %67, %cst_45 {dimension_numbers = #tpu.dot_dimension_numbers<[1], [0], [0], [1], [0, 0, 1, 1], [], []>} : vector<8x32xbf16>, vector<32x34xbf16>, vector<8x34xf32> -> vector<8x34xf32>
    %c0_46 = arith.constant 0 : index
    %c0_47 = arith.constant 0 : index
    %69 = vector.load %arg12[%c0_46, %c0_47] : memref<1x34xf32, #tpu.memory_space<vmem>>, vector<1x34xf32>
    %70 = vector.broadcast %69 : vector<1x34xf32> to vector<8x34xf32>
    %71 = arith.addf %68, %70 : vector<8x34xf32>
    %c0_48 = arith.constant 0 : index
    %c0_49 = arith.constant 0 : index
    %72 = vector.load %arg13[%c0_48, %c0_49] : memref<8x34xf32, #tpu.memory_space<vmem>>, vector<8x34xf32>
    tpu.vector_store %arg13[%c0_48, %c0_49], %71 {strides = array<i32>} : memref<8x34xf32, #tpu.memory_space<vmem>>, vector<8x34xf32>,
    return
  }
  func.func @transform_0(%arg0: i32) -> (i32, i32) {
    %c0_i32 = arith.constant 0 : i32
    %c0_i32_0 = arith.constant 0 : i32
    return %arg0, %c0_i32 : i32, i32
  }
  func.func @transform_1(%arg0: i32) -> (i32, i32) {
    %c0_i32 = arith.constant 0 : i32
    %c0_i32_0 = arith.constant 0 : i32
    return %arg0, %c0_i32 : i32, i32
  }
  func.func @transform_2(%arg0: i32) -> (i32, i32) {
    %c0_i32 = arith.constant 0 : i32
    %c0_i32_0 = arith.constant 0 : i32
    return %arg0, %c0_i32 : i32, i32
  }
  func.func @transform_3(%arg0: i32) -> (i32, i32) {
    %c0_i32 = arith.constant 0 : i32
    %c0_i32_0 = arith.constant 0 : i32
    %c0_i32_1 = arith.constant 0 : i32
    return %c0_i32, %c0_i32_0 : i32, i32
  }
  func.func @transform_4(%arg0: i32) -> (i32, i32) {
    %c0_i32 = arith.constant 0 : i32
    %c0_i32_0 = arith.constant 0 : i32
    %c0_i32_1 = arith.constant 0 : i32
    return %c0_i32, %c0_i32_0 : i32, i32
  }
  func.func @transform_5(%arg0: i32) -> (i32, i32) {
    %c0_i32 = arith.constant 0 : i32
    %c0_i32_0 = arith.constant 0 : i32
    %c0_i32_1 = arith.constant 0 : i32
    return %c0_i32, %c0_i32_0 : i32, i32
  }
  func.func @transform_6(%arg0: i32) -> (i32, i32, i32) {
    %c0_i32 = arith.constant 0 : i32
    %c0_i32_0 = arith.constant 0 : i32
    %c0_i32_1 = arith.constant 0 : i32
    %c0_i32_2 = arith.constant 0 : i32
    return %c0_i32, %c0_i32_0, %c0_i32_1 : i32, i32, i32
  }
  func.func @transform_7(%arg0: i32) -> (i32, i32) {
    %c0_i32 = arith.constant 0 : i32
    %c0_i32_0 = arith.constant 0 : i32
    %c0_i32_1 = arith.constant 0 : i32
    return %c0_i32, %c0_i32_0 : i32, i32
  }
  func.func @transform_8(%arg0: i32) -> (i32, i32, i32) {
    %c0_i32 = arith.constant 0 : i32
    %c0_i32_0 = arith.constant 0 : i32
    %c0_i32_1 = arith.constant 0 : i32
    %c0_i32_2 = arith.constant 0 : i32
    return %c0_i32, %c0_i32_0, %c0_i32_1 : i32, i32, i32
  }
  func.func @transform_9(%arg0: i32) -> (i32, i32, i32) {
    %c0_i32 = arith.constant 0 : i32
    %c0_i32_0 = arith.constant 0 : i32
    %c0_i32_1 = arith.constant 0 : i32
    %c0_i32_2 = arith.constant 0 : i32
    return %c0_i32, %c0_i32_0, %c0_i32_1 : i32, i32, i32
  }
  func.func @transform_10(%arg0: i32) -> (i32, i32) {
    %c0_i32 = arith.constant 0 : i32
    %c0_i32_0 = arith.constant 0 : i32
    %c0_i32_1 = arith.constant 0 : i32
    return %c0_i32, %c0_i32_0 : i32, i32
  }
  func.func @transform_11(%arg0: i32) -> (i32, i32) {
    %c0_i32 = arith.constant 0 : i32
    %c0_i32_0 = arith.constant 0 : i32
    %c0_i32_1 = arith.constant 0 : i32
    return %c0_i32, %c0_i32_0 : i32, i32
  }
  func.func @transform_12(%arg0: i32) -> (i32, i32) {
    %c0_i32 = arith.constant 0 : i32
    %c0_i32_0 = arith.constant 0 : i32
    return %arg0, %c0_i32 : i32, i32
  }
}

</mosaic_0001>

<bundles_post_ra>
// kernel: mixed_deep_mlp_forward.1
= control target key start
LH: loop header
LB: loop body
LE: loop exit
PB: predicated region body
PF: predicated region fallthrough
CT: control target
= control target key end

     0   :  { %vm56_vm0 = vcmask 1044480   ;;  %v1026_v0 = vmov 0   ;;  %v1027_v2 = vmov 0.0   ;;  %v46_v4 = vlaneseq  ;;  %s1232_s2 = inlined_call_operand.vmem [shape: f32[8,1], index: 2, kind: input, shape index: {}]   ;;  %s1233_s4 = inlined_call_operand.vmem [shape: f32[5,40], index: 4, kind: input, shape index: {}]   ;;  %s1234_s1 = inlined_call_operand.vmem [shape: s32[8,5], index: 1, kind: input, shape index: {}]   ;;  %s1235_s3 = inlined_call_operand.vmem [shape: f32[4,32], index: 3, kind: input, shape index: {}]   ;;  %s1236_s0 = inlined_call_operand.vmem [shape: f32[8,4], index: 0, kind: input, shape index: {}]   ;;  %s1237_s6 = inlined_call_operand.vmem [shape: f32[2,8,32], index: 6, kind: input, shape index: {}]   ;;  %s1238_s5 = inlined_call_operand.vmem [shape: f32[40,32], index: 5, kind: input, shape index: {}]   ;;  %s1239_s8 = inlined_call_operand.vmem [shape: bf16[2,32,32], index: 8, kind: input, shape index: {}]   ;;  %s1240_s7 = inlined_call_operand.vmem [shape: f32[1,32], index: 7, kind: input, shape index: {}]   ;;  %s1241_s10 = inlined_call_operand.vmem [shape: bf16[32,34], index: 10, kind: input, shape index: {}]   ;;  %s1242_s9 = inlined_call_operand.vmem [shape: f32[2,1,32], index: 9, kind: input, shape index: {}]   ;;  %s1243_s11 = inlined_call_operand.vmem [shape: f32[1,34], index: 11, kind: input, shape index: {}]   ;;  %s1244_s12 = inlined_call_operand.vmem [shape: f32[8,34], index: 12, kind: output, shape index: {}]  }
   0x1   :  { %1013 = vset.pattern.permute.xlu0 %v1026_v0  ;;  %v292_v1 = vld [vmem:[%s1232_s2] sm:$0xff]  ;;  %936 = vmatprep.subr.mxu0 %v1027_v2  ;;  %vm1028_vm1 = vmmov 0   ;;  %vm52_vm2 = vcmask 39936   ;;  %vm215_vm3 = vcmask 1043456   ;;  %vm211_vm4 = vcmask 31744   ;;  %v133_v15 = vld [vmem:[%s1238_s5 + $0x8] sm:$0xff] }
   0x2   :  { %v51_v3 = vld [vmem:[%s1233_s4] sm:$0x1f]  ;;  %295 = vperm.xlu0 %1013, %v292_v1   ;;  %938 = vmatprep.mubr.msk.f32.mxu0 %vm1028_vm1, %v1027_v2  ;;  %v47_v6 = vand.u32 127, %v46_v4  ;;  %v1029_v16 = vmov 0.0|0.0   ;;  %v134_v18 = vld [vmem:[%s1238_s5 + $0x10] sm:$0xff]  ;;  %v135_v19 = vld [vmem:[%s1238_s5 + $0x18] sm:$0xff] }
   0x3   :  { %937 = vmatpush3.msk.msra.mxu0 %vm56_vm0, %v51_v3  ;;  %v44_v5 = vld [vmem:[%s1234_s1] sm:$0xff]  ;;  %951 = vmatprep.mubr.msk.f32.mxu1 %vm1028_vm1, %v1027_v2  ;;  %v997_v20 = vpack.c.bf16 %v135_v19, %v134_v18  ;;  %v1030_v38 = vmov 683565275   ;;  %v1031_v40 = vmov 2475754826   ;;  %vm404_vm15 = vcmask 64512  }
   0x4   :  { %954 = vmatprep.subr.mxu0 %v1027_v2  ;;  %v45_v7 = vcvt.s32.f32 %v44_v5  ;;  %v1116_v8 = vcvt.s32.f32 %v47_v6  ;;  %v43_v11 = vld [vmem:[%s1235_s3] sm:$0xf]  ;;  %993 = vmatprep.subr.bf16.mxu1 %v1029_v16  ;;  %v1032_v42 = vmov 2131351028   ;;  %v1033_v44 = vmov 2102212464  }
   0x5   :  { %v42_v12 = vld [vmem:[%s1236_s0] sm:$0xff]  ;;  %v1034_v46 = vmov 920167782   ;;  %v1035_v52 = vmov 1326507024  }
   0x6   :  { %v49_v9 = vmul.f32 8.0, %v1116_v8  ;;  %v403_v13 = vld [vmem:[%s1237_s6] sm:$0xff]  ;;  %v289_v22 = vmul.f32 -1.3157629, %v1116_v8 }
   0x7   :  { %v132_v14 = vld [vmem:[%s1238_s5] sm:$0xff] }
   0x8   :  { %v50_v10 = vadd.f32 %v49_v9, %v45_v7  ;;  %v994_v17 = vpack.c.bf16 %v133_v15, %v132_v14  ;;  %v136_v21 = vld [vmem:[%s1238_s5 + $0x20] sm:$0xff]  ;;  %v290_v23 = vmul.f32 1.442695, %v289_v22 }
   0xa   :  { %939 = vmatmul.mubr.msk.f32.vlgmr.msra.gmra.mrb[0].mxu0 %vm52_vm2, %v50_v10  ;;  %995 = vmatpush3.bf16.msra.mxu1 %v994_v17  ;;  %1020 = vpow2.f32 %v290_v23 }
   0xb   :  { %956 = vmatprep.mubr.msk.f32.mxu0 %vm1028_vm1, %v1027_v2  ;;  %955 = vmatpush3.msk.msra.mxu0 %vm215_vm3, %v43_v11 }
   0xc   :  { %959 = vmatprep.subr.mxu0 %v1027_v2  ;;  %996 = vmatprep.subr.bf16.mxu1 %v1029_v16 }
   0xe   :  { %957 = vmatmul.mubr.msk.f32.vlgmr.msra.gmra.mrb[2].mxu0 %vm211_vm4, %v42_v12  ;;  %998 = vmatpush3.bf16.msra.mxu1 %v997_v20 }
   0xf   :  { %960 = vmatpush3.msra.mxu0 %v403_v13  ;;  %961 = vmatprep.mubr.msk.f32.mxu0 %vm1028_vm1, %v1027_v2 }
  0x10   :  { %964 = vmatprep.subr.mxu0 %v1027_v2  ;;  %949 = vmatprep.subr.mxu1 %v1027_v2 }
  0x12   :  { %950 = vmatpush3.msra.mxu1 %v136_v21 }
  0x13   :  { %969 = vmatprep.subr.bf16.mxu1 %v1027_v2 }
  0x14   :  { %v1021_v24 = vpop.eup %1020 }
  0x81   :  { %v296_v25 = vpop.permute.xlu0 %295 }
  0x82   :  { %v1152_v26 = vmul.f32 %v1021_v24, %v296_v25 }
  0x84   :  { %v302_v27 = vand.u32 2139095040, %v1152_v26  ;;  %v299_v29 = vand.u32 2147483647, %v1152_v26  ;;  %vm301_vm12 = vcmp.lt.s32.totalorder %v1152_v26, 0 }
  0x86   :  { %v303_v28 = vshrl.u32 %v302_v27, 23  ;;  %v306_v32 = vand.u32 8388607, %v299_v29  ;;  %vm300_vm13 = vcmp.le.f32.partialorder %v299_v29, 0.7853982 }
  0x88   :  { %v884_v30 = vadd.s32 4294967169, %v303_v28  ;;  %v307_v35 = vor.u32 8388608, %v306_v32 }
  0x8a   :  { %v309_v31 = vadd.s32 1, %v884_v30  ;;  %v347_v57 = vshll.u32 %v307_v35, 8 }
  0x8c   :  { %vm310_vm5 = vcmp.gt.s32.totalorder %v309_v31, 0 }
  0x8d   :  { %v311_v33 = vsel %vm310_vm5, %v309_v31, 0  ;;  %vm391_vm5 = vweird.f32 %v1152_v26 }
  0x8e   :  { %v313_v34 = vand.u32 31, %v311_v33  ;;  %v312_v36 = vshrl.u32 %v311_v33, 5 }
  0x90   :  { %v314_v37 = vsub.s32 32, %v313_v34  ;;  %v316_v39 = vshll.u32 %v1030_v38, %v313_v34  ;;  %v319_v41 = vshll.u32 %v1031_v40, %v313_v34  ;;  %v322_v43 = vshll.u32 %v1032_v42, %v313_v34 }
  0x91   :  { %v325_v45 = vshll.u32 %v1033_v44, %v313_v34  ;;  %v328_v47 = vshll.u32 %v1034_v46, %v313_v34  ;;  %vm331_vm6 = vcmp.lt.s32.totalorder %v312_v36, 1  ;;  %vm334_vm7 = vcmp.lt.s32.totalorder %v312_v36, 4 }
  0x92   :  { %v317_v48 = vshrl.u32 %v1031_v40, %v314_v37  ;;  %v320_v49 = vshrl.u32 %v1032_v42, %v314_v37  ;;  %v323_v50 = vshrl.u32 %v1033_v44, %v314_v37  ;;  %v326_v51 = vshrl.u32 %v1034_v46, %v314_v37 }
  0x93   :  { %v329_v53 = vshrl.u32 %v1035_v52, %v314_v37  ;;  %v315_v58 = vshrl.u32 %v1030_v38, %v314_v37  ;;  %vm333_vm8 = vcmp.lt.s32.totalorder %v312_v36, 3  ;;  %vm332_vm9 = vcmp.lt.s32.totalorder %v312_v36, 2 }
  0x94   :  { %v318_v54 = vor.u32 %v317_v48, %v316_v39  ;;  %v321_v55 = vor.u32 %v320_v49, %v319_v41  ;;  %v324_v56 = vor.u32 %v323_v50, %v322_v43  ;;  %v327_v59 = vor.u32 %v326_v51, %v325_v45 }
  0x95   :  { %v330_v60 = vor.u32 %v329_v53, %v328_v47 }
  0x96   :  { %v336_v61 = vsel %vm334_vm7, %v324_v56, 2102212464  ;;  %v339_v62 = vsel %vm331_vm6, %v318_v54, %v321_v55  ;;  %v343_v63 = vsel %vm331_vm6, %v321_v55, %v324_v56  ;;  %v340_v0 = vsel %vm334_vm7, %v327_v59, 920167782 }
  0x97   :  { %v344_v1 = vsel %vm334_vm7, %v330_v60, 1326507024  ;;  %v341_v3 = vsel %vm333_vm8, %v324_v56, %v340_v0  ;;  %v335_v5 = vsel %vm331_vm6, %v315_v58, %v318_v54  ;;  %v337_v6 = vsel %vm333_vm8, %v321_v55, %v336_v61 }
  0x98   :  { %v345_v4 = vsel %vm333_vm8, %v327_v59, %v344_v1  ;;  %v342_v7 = vsel %vm332_vm9, %v339_v62, %v341_v3  ;;  %v338_v14 = vsel %vm332_vm9, %v335_v5, %v337_v6  ;;  %v893_v59 = vld [vmem:[%s1237_s6 + $0x8] sm:$0xff]  ;;  %vm137_vm7 = vcmask 326656  }
  0x99   :  { %v346_v9 = vsel %vm332_vm9, %v343_v63, %v345_v4  ;;  %v1164_v12 = vmul.u32.u64.low %v347_v57, %v342_v7  ;;  %v1165_v13 = vmul.u32.u64.high %v347_v57, %v342_v7, %v1164_v12  ;;  %v354_v16 = vmul.u32 %v347_v57, %v338_v14  ;;  %v1014_v4 = vld [vmem:[%s1239_s8] sm:$0xff]  }
  0x9a   :  { %v1161_v10 = vmul.u32.u64.low %v347_v57, %v346_v9  ;;  %v1162_v11 = vmul.u32.u64.high %v347_v57, %v346_v9, %v1161_v10  ;;  %v895_v14 = vld [vmem:[%s1240_s7] ss:$0 sm:$0xff]  ;;  %vm691_vm9 = vcmask 261120  }
  0x9b   :  { %v357_v15 = vadd.s32 1, %v1165_v13 }
  0x9c   :  { %vm356_vm10 = vc.u32 %v1162_v11, %v1164_v12  ;;  %v355_v30 = vadd.s32 %v1164_v12, %v1162_v11 }
  0x9d   :  { %v358_v17 = vsel %vm356_vm10, %v357_v15, %v1165_v13 }
  0x9e   :  { %v359_v18 = vadd.s32 %v358_v17, %v354_v16 }
  0xa0   :  { %v360_v19 = vadd.s32 536870912, %v359_v18 }
  0xa2   :  { %v361_v20 = vshrl.u32 %v360_v19, 30  ;;  %v1016_v19 = vld [vmem:[%s1239_s8 + $0x10] sm:$0xff]  }
  0xa4   :  { %v362_v21 = vshll.u32 %v361_v20, 30  ;;  %v385_v42 = vsub.s32 4, %v361_v20 }
  0xa6   :  { %v363_v22 = vsub.s32 %v359_v18, %v362_v21  ;;  %v386_v45 = vsel %vm301_vm12, %v385_v42, %v361_v20  ;;  %v1017_v20 = vld [vmem:[%s1239_s8 + $0x18] sm:$0xff]   ;;  %v1018_v21 = vld [vmem:[%s1241_s10] sm:$0xff]  }
  0xa7   :  { %v388_v47 = vsel %vm300_vm13, 0, %v386_v45 }
  0xa8   :  { %v365_v23 = vsub.s32 0, %v363_v22  ;;  %v392_v48 = vadd.s32 3, %v388_v47  ;;  %v572_v50 = vand.u32 3, %v388_v47 }
  0xaa   :  { %v885_v24 = vmin.u32 %v365_v23, %v363_v22  ;;  %v393_v49 = vand.u32 3, %v392_v48  ;;  %vm574_vm2 = vcmp.eq.s32.totalorder %v572_v50, 0  ;;  %vm577_vm3 = vcmp.eq.s32.totalorder %v572_v50, 2 }
  0xab   :  { %vm573_vm6 = vcmp.lt.s32.totalorder %v572_v50, 2 }
  0xac   :  { %v367_v25 = vclz %v885_v24  ;;  %vm398_vm14 = vcmp.eq.s32.totalorder %v393_v49, 2  ;;  %vm395_vm0 = vcmp.eq.s32.totalorder %v393_v49, 0  ;;  %vm394_vm4 = vcmp.lt.s32.totalorder %v393_v49, 2 }
  0xae   :  { %v886_v27 = vadd.s32 4294967294, %v367_v25 }
  0xb0   :  { %vm887_vm11 = vcmp.lt.s32.totalorder %v886_v27, 0 }
  0xb1   :  { %v370_v28 = vsel %vm887_vm11, 0, %v886_v27 }
  0xb2   :  { %v371_v31 = vsub.s32 32, %v370_v28  ;;  %v375_v32 = vsub.s32 4294967266, %v370_v28  ;;  %v372_v33 = vshll.u32 %v363_v22, %v370_v28  ;;  %v896_v22 = vld [vmem:[%s1242_s9] ss:$0 sm:$0xff] }
  0xb4   :  { %v373_v34 = vshrl.u32 %v355_v30, %v371_v31  ;;  %v376_v35 = vadd.s32 127, %v375_v32  ;;  %v1019_v32 = vld [vmem:[%s1241_s10 + $0x8] sm:$0xff]  }
  0xb6   :  { %v374_v36 = vor.u32 %v373_v34, %v372_v33  ;;  %v377_v37 = vshll.u32 %v376_v35, 23 }
  0xb8   :  { %v378_v38 = vor.u32 4788187, %v377_v37  ;;  %v381_v40 = vcvt.s32.f32 %v374_v36 }
  0xba   :  { %v379_v39 = vand.u32 2147483647, %v378_v38 }
  0xbc   :  { %v382_v41 = vmul.f32 %v381_v40, %v379_v39  ;;  %v909_v40 = vld [vmem:[%s1243_s11] ss:$0 sm:$0xff] }
  0xbe   :  { %v383_v43 = vxor.u32 2147483648, %v382_v41 }
  0xc0   :  { %v384_v44 = vsel %vm301_vm12, %v383_v43, %v382_v41 }
  0xc1   :  { %v387_v46 = vsel %vm300_vm13, %v1152_v26, %v384_v44 }
  0xc2   :  { %1022 = vcosq.f32 %v387_v46 }
  0xc3   :  { %1024 = vsinq.f32 %v387_v46 }
  0xcc   :  { %v1023_v51 = vpop.eup %1022 }
  0xcd   :  { %v1025_v52 = vpop.eup %1024  ;;  %v399_v53 = vxor.u32 2147483648, %v1023_v51 }
  0xce   :  { %v396_v54 = vxor.u32 2147483648, %v1025_v52 }
  0xcf   :  { %v400_v55 = vsel %vm398_vm14, %v399_v53, %v1025_v52  ;;  %v579_v57 = vsel %vm577_vm3, %v399_v53, %v1025_v52 }
  0xd0   :  { %v397_v29 = vsel %vm395_vm0, %v1023_v51, %v396_v54  ;;  %v576_v56 = vsel %vm574_vm2, %v1023_v51, %v396_v54 }
  0xd1   :  { %v401_v58 = vsel %vm394_vm4, %v397_v29, %v400_v55  ;;  %v580_v61 = vsel %vm573_vm6, %v576_v56, %v579_v57 }
  0xd2   :  { %v402_v60 = vsel %vm391_vm5, nan, %v401_v58  ;;  %v581_v62 = vsel %vm391_vm5, nan, %v580_v61 }
  0xd3   :  { %962 = vmatmul.mubr.msk.f32.vlgmr.msra.gmra.mrb[4].mxu0 %vm404_vm15, %v402_v60 }
  0xd4   :  { %965 = vmatpush3.msra.mxu0 %v893_v59  ;;  %966 = vmatprep.mubr.msk.f32.mxu0 %vm1028_vm1, %v1027_v2 }
  0xd5   :  { %977 = vmatprep.subr.bf16.mxu0 %v1027_v2 }
  0xd7   :  { %967 = vmatmul.mubr.msk.f32.vlgmr.msra.gmra.mrb[6].mxu0 %vm404_vm15, %v581_v62 }
  0xd8   :  { %981 = vmatprep.mubr.msk.bf16.mxu0 %vm1028_vm1, %v1027_v2  ;;  %978 = vmatpush3.bf16.msra.mxu0 %v1016_v19 }
  0xd9   :  { %979 = vmatprep.subr.bf16.mxu0 %v1027_v2 }
  0xdc   :  { %980 = vmatpush3.bf16.msra.mxu0 %v1017_v20 }
  0xdd   :  { %v126_v26 = vpop.f32.mrb[0].mxu0 }
  0xde   :  { %vm130_vm8 = vcmp.eq.f32.partialorder %v126_v26, %v1116_v8  ;;  %v940_v63 = vpop.f32.mrb[1].mxu0  ;;  %v1015_v8 = vld [vmem:[%s1239_s8 + $0x8] sm:$0xff]  }
  0xdf   :  { %v131_v0 = vsel %vm130_vm8, 1.0, %v1027_v2 }
  0xe0   :  { %952 = vmatmul.mubr.msk.f32.vlgmr.msra.gmra.mrb[0].mxu1 %vm137_vm7, %v131_v0 }
  0xe1   :  { %973 = vmatprep.mubr.msk.bf16.mxu1 %vm1028_vm1, %v1027_v2  ;;  %v285_v1 = vpop.f32.mrb[2].mxu0  ;;  %970 = vmatpush3.bf16.msra.mxu1 %v1014_v4 }
  0xe2   :  { %v958_v3 = vpop.f32.mrb[3].mxu0  ;;  %971 = vmatprep.subr.bf16.mxu1 %v1027_v2 }
  0xe5   :  { %972 = vmatpush3.bf16.msra.mxu1 %v1015_v8 }
  0xe6   :  { %985 = vmatprep.subr.bf16.mxu1 %v1027_v2 }
 0x1a6   :  { %v474_v5 = vpop.f32.mrb[4].mxu0 }
 0x1a7   :  { %v963_v6 = vpop.f32.mrb[5].mxu0 }
 0x1aa   :  { %v653_v7 = vpop.f32.mrb[6].mxu0 }
 0x1ab   :  { %v968_v9 = vpop.f32.mrb[7].mxu0 }
 0x1b3   :  { %v207_v10 = vpop.f32.mrb[0].mxu1 }
 0x1b4   :  { %v286_v11 = vadd.f32 %v285_v1, %v207_v10  ;;  %v953_v12 = vpop.f32.mrb[1].mxu1 }
 0x1b6   :  { %v478_v13 = vadd.f32 %v474_v5, %v286_v11 }
 0x1b8   :  { %v657_v15 = vadd.f32 %v653_v7, %v478_v13 }
 0x1ba   :  { %v665_v16 = vadd.f32 %v895_v14, %v657_v15 }
 0x1bc   :  { %v666_v17 = vmax.f32 %v665_v16, 0.0 }
 0x1be   :  { %v667_v18 = vpack.c.bf16 %v666_v17, %v666_v17 }
 0x1c0   :  { %974 = vmatmul.mubr.msk.bf16.vlgmr.msra.gmra.mrb[4].mxu1 %vm691_vm9, %v667_v18 }
 0x1c1   :  { %989 = vmatprep.mubr.msk.bf16.mxu1 %vm1028_vm1, %v1027_v2  ;;  %986 = vmatpush3.bf16.msra.mxu1 %v1018_v21  ;;  %vm873_vm1 = vcmask 277504  }
 0x1c2   :  { %987 = vmatprep.subr.bf16.mxu1 %v1027_v2  ;;  %v905_v2 = vld [vmem:[%s1242_s9 + $0x1] ss:$0 sm:$0xff] }
 0x1c5   :  { %988 = vmatpush3.bf16.msra.mxu1 %v1019_v32 }
 0x293   :  { %v729_v23 = vpop.f32.mrb[4].mxu1 }
 0x294   :  { %v730_v24 = vadd.f32 %v896_v22, %v729_v23  ;;  %v975_v25 = vpop.f32.mrb[5].mxu1 }
 0x295   :  { %v732_v27 = vpop.f32.mrb[6].mxu1 }
 0x296   :  { %v735_v28 = vmax.f32 %v730_v24, 0.0  ;;  %v976_v30 = vpop.f32.mrb[7].mxu1 }
 0x298   :  { %v736_v31 = vpack.c.bf16 %v735_v28, %v735_v28 }
 0x29a   :  { %982 = vmatmul.mubr.msk.bf16.vlgmr.msra.gmra.mrb[8].mxu0 %vm691_vm9, %v736_v31 }
 0x36d   :  { %v799_v33 = vpop.f32.mrb[8].mxu0 }
 0x36e   :  { %v800_v34 = vadd.f32 %v905_v2, %v799_v33  ;;  %v983_v35 = vpop.f32.mrb[9].mxu0 }
 0x36f   :  { %v802_v36 = vpop.f32.mrb[10].mxu0 }
 0x370   :  { %v805_v37 = vmax.f32 %v800_v34, 0.0  ;;  %v984_v38 = vpop.f32.mrb[11].mxu0 }
 0x372   :  { %v806_v39 = vpack.c.bf16 %v805_v37, %v805_v37 }
 0x374   :  { %990 = vmatmul.mubr.msk.bf16.vlgmr.msra.gmra.mrb[8].mxu1 %vm691_vm9, %v806_v39 }
 0x447   :  { %v867_v41 = vpop.f32.mrb[8].mxu1 }
 0x448   :  { %v868_v42 = vadd.f32 %v909_v40, %v867_v41  ;;  %v991_v43 = vpop.f32.mrb[9].mxu1 }
 0x449   :  { %v870_v44 = vpop.f32.mrb[10].mxu1 }
 0x44a   :  { %874 = vst.msk [vmem:[%s1244_s12] sm:$0xff] %vm873_vm1, %v868_v42  ;;  %v992_v45 = vpop.f32.mrb[11].mxu1 }

</bundles_post_ra>
